<compile_context>
chip_gen: v5e
topology: v5e:2x2
jax: 0.10.0
libtpu: 0.0.40
codegen_flags: <defaults>
</compile_context>

<pallas_src>
import functools

import jax
import jax.numpy as jnp
from jax.experimental import pallas as pl
from jax.experimental.pallas import tpu as pltpu


# ----------------------------- Pallas kernel -------------------------------
def _rmsnorm_kernel(x_ref, w_ref, o_ref, *, eps, inv_h):
    # x_ref: (TM, H) token tile, w_ref: (1, H) weight, o_ref: (TM, H) output.
    x32 = x_ref[...].astype(jnp.float32)                      # upcast (spec)
    ss = jnp.sum(x32 * x32, axis=-1, keepdims=True)           # (TM, 1)
    inv = jax.lax.rsqrt(ss * inv_h + eps)                     # EUP rsqrt
    # Match PyTorch order: cast normalized activations back to the input
    # dtype *before* multiplying by the weight; emit as one fused expression.
    o_ref[...] = (w_ref[...] * (x32 * inv).astype(x_ref.dtype)).astype(o_ref.dtype)


# ------------------------------ JAX wrapper ---------------------------------
def qwen3_moe_rmsnorm(hidden_states, weight, *, eps=1e-6, block_tokens=None):
    """RMSNorm over the last axis of `hidden_states` with learnable `weight`."""
    orig_shape = hidden_states.shape
    H = int(orig_shape[-1])
    T = 1
    for d in orig_shape[:-1]:
        T *= int(d)
    x = hidden_states.reshape(T, H)

    # Output dtype follows PyTorch promotion of `weight * x.to(input_dtype)`.
    out_dtype = jnp.result_type(hidden_states.dtype, weight.dtype)
    in_item = jnp.dtype(hidden_states.dtype).itemsize
    out_item = jnp.dtype(out_dtype).itemsize
    w_item = jnp.dtype(weight.dtype).itemsize

    # Generation-aware VMEM capacity (v5e/v6e: 128 MiB, v7x: 64 MiB/TC).
    try:
        vmem_cap = int(pltpu.get_tpu_info().vmem_capacity_bytes)
    except Exception:  # pragma: no cover - conservative fallback (v7x floor)
        vmem_cap = 64 * 1024 * 1024

    # Per-row VMEM footprint: double-buffered input + output blocks plus ~2
    # full-tile f32 temporaries from the upcast/normalize chain.
    per_row_bytes = H * (2 * in_item + 2 * out_item + 2 * 4)

    if block_tokens is None:
        # Target ~4 MiB of input per block (roofline knee), then cap so the
        # working set stays well inside this generation's VMEM.
        tm = max(8, (4 * 1024 * 1024) // max(1, H * in_item))
        budget = int(0.70 * vmem_cap)
        tm = min(tm, max(8, budget // max(1, per_row_bytes)))
        tm = min(tm, 8192)
    else:
        tm = int(block_tokens)

    if tm >= T:
        tm = T                        # full-extent block: exempt from 8-row rule
    else:
        tm = max(8, tm - (tm % 8))    # keep 8-sublane alignment

    n_tiles = pl.cdiv(T, tm)          # ragged last block handled by Pallas masking
    w2d = weight.reshape(1, H)

    work_bytes = tm * per_row_bytes + 2 * H * w_item
    vmem_limit = min(int(0.9 * vmem_cap), max(work_bytes + (2 << 20), 16 << 20))

    out = pl.pallas_call(
        functools.partial(_rmsnorm_kernel, eps=float(eps), inv_h=1.0 / float(H)),
        out_shape=jax.ShapeDtypeStruct((T, H), out_dtype),
        grid_spec=pltpu.PrefetchScalarGridSpec(
            num_scalar_prefetch=0,
            grid=(n_tiles,),
            in_specs=[
                pl.BlockSpec((tm, H), lambda i: (i, 0)),   # token tile
                pl.BlockSpec((1, H), lambda i: (0, 0)),    # weight (resident)
            ],
            out_specs=pl.BlockSpec((tm, H), lambda i: (i, 0)),
        ),
        compiler_params=pltpu.CompilerParams(
            # Token tiles are independent -> shard across v7x's 2 TensorCores.
            dimension_semantics=("parallel",),
            vmem_limit_bytes=vmem_limit),
        cost_estimate=pl.CostEstimate(
            flops=4 * T * H,                 # square + reduce + scale + weight mul
            transcendentals=T,               # one rsqrt per token row
            bytes_accessed=T * H * (in_item + out_item) + H * w_item),
    )(x, w2d)

    return out.reshape(orig_shape)


# ---------------------------- pure-JAX reference ----------------------------
def _reference(hidden_states, weight, eps):
    x32 = hidden_states.astype(jnp.float32)
    var = jnp.mean(x32 * x32, axis=-1, keepdims=True)
    x_norm = x32 * jax.lax.rsqrt(var + eps)
    return weight * x_norm.astype(hidden_states.dtype)


# --------------------------------- main --------------------------------------
if __name__ == "__main__":
    eps = 1e-6
    key = jax.random.PRNGKey(0)
    k_x, k_w, k_x2 = jax.random.split(key, 3)

    # Primary test: (batch, seq, hidden) in float32.
    batch, seq, hidden = 2, 8, 128
    hidden_states = jax.random.normal(k_x, (batch, seq, hidden), jnp.float32)
    # PyTorch init is ones; perturb slightly so the weight multiply is tested.
    weight = 1.0 + 0.1 * jax.random.normal(k_w, (hidden,), jnp.float32)

    run = jax.jit(functools.partial(qwen3_moe_rmsnorm, eps=eps))
    out = jax.block_until_ready(run(hidden_states, weight))
    ref = _reference(hidden_states, weight, eps)
    assert out.shape == hidden_states.shape
    assert out.dtype == ref.dtype
    assert jnp.allclose(out, ref, atol=1e-5, rtol=1e-5), "f32 mismatch vs reference"

    # Ragged-grid test: T = 15 tokens with an 8-row tile (no host pad/slice).
    x2 = jax.random.normal(k_x2, (3, 5, hidden), jnp.float32)
    run_ragged = jax.jit(functools.partial(qwen3_moe_rmsnorm, eps=eps, block_tokens=8))
    out2 = jax.block_until_ready(run_ragged(x2, weight))
    ref2 = _reference(x2, weight, eps)
    assert jnp.allclose(out2, ref2, atol=1e-5, rtol=1e-5), "ragged mismatch vs reference"

    # bf16 activations with f32 weight (typical deployment mix / cast path).
    x3 = hidden_states.astype(jnp.bfloat16)
    out3 = jax.block_until_ready(run(x3, weight))
    ref3 = _reference(x3, weight, eps)
    assert out3.dtype == ref3.dtype
    assert jnp.allclose(out3.astype(jnp.float32), ref3.astype(jnp.float32),
                        atol=2e-2, rtol=2e-2), "bf16 mismatch vs reference"

    print("KERNEL_OK")
</pallas_src>

<mosaic_0001>
module attributes {stable_mosaic.version = 11 : i64} {
  func.func @_rmsnorm_kernel(%arg0: i32, %arg1: memref<16x128xf32, #tpu.memory_space<vmem>>, %arg2: memref<1x128xf32, #tpu.memory_space<vmem>>, %arg3: memref<16x128xf32, #tpu.memory_space<vmem>>) attributes {dimension_semantics = [#tpu.dimension_semantics<parallel>], iteration_bounds = array<i64: 1>, scalar_prefetch = 0 : i64, scratch_operands = 0 : i64, tpu.core_type = #tpu.core_type<tc>, window_params = [{transform_indices = @transform_0, window_bounds = array<i64: 16, 128>}, {pipeline_mode = #tpu.pipeline_mode<synchronous>, transform_indices = @transform_1, window_bounds = array<i64: 1, 128>}, {transform_indices = @transform_2, window_bounds = array<i64: 16, 128>}]} {
    %c0 = arith.constant 0 : index
    %c0_0 = arith.constant 0 : index
    %0 = vector.load %arg1[%c0, %c0_0] : memref<16x128xf32, #tpu.memory_space<vmem>>, vector<16x128xf32>
    %1 = arith.mulf %0, %0 : vector<16x128xf32>
    %cst = arith.constant dense<0.000000e+00> : vector<16xf32>
    %2 = vector.multi_reduction <add>, %1, %cst [1] : vector<16x128xf32> to vector<16xf32>
    %3 = vector.shape_cast %2 : vector<16xf32> to vector<16x1xf32>
    %cst_1 = arith.constant 7.812500e-03 : f32
    %4 = vector.broadcast %cst_1 : f32 to vector<16x1xf32>
    %5 = arith.mulf %3, %4 : vector<16x1xf32>
    %cst_2 = arith.constant 9.99999997E-7 : f32
    %6 = vector.broadcast %cst_2 : f32 to vector<16x1xf32>
    %7 = arith.addf %5, %6 : vector<16x1xf32>
    %8 = math.rsqrt %7 : vector<16x1xf32>
    %c0_3 = arith.constant 0 : index
    %c0_4 = arith.constant 0 : index
    %9 = vector.load %arg2[%c0_3, %c0_4] : memref<1x128xf32, #tpu.memory_space<vmem>>, vector<1x128xf32>
    %10 = vector.broadcast %8 : vector<16x1xf32> to vector<16x128xf32>
    %11 = arith.mulf %0, %10 : vector<16x128xf32>
    %12 = vector.broadcast %9 : vector<1x128xf32> to vector<16x128xf32>
    %13 = arith.mulf %12, %11 : vector<16x128xf32>
    %c0_5 = arith.constant 0 : index
    %c0_6 = arith.constant 0 : index
    %14 = vector.load %arg3[%c0_5, %c0_6] : memref<16x128xf32, #tpu.memory_space<vmem>>, vector<16x128xf32>
    tpu.vector_store %arg3[%c0_5, %c0_6], %13 {strides = array<i32>} : memref<16x128xf32, #tpu.memory_space<vmem>>, vector<16x128xf32>,
    return
  }
  func.func @transform_0(%arg0: i32) -> (i32, i32) {
    %c0_i32 = arith.constant 0 : i32
    %c0_i32_0 = arith.constant 0 : i32
    return %arg0, %c0_i32 : i32, i32
  }
  func.func @transform_1(%arg0: i32) -> (i32, i32) {
    %c0_i32 = arith.constant 0 : i32
    %c0_i32_0 = arith.constant 0 : i32
    %c0_i32_1 = arith.constant 0 : i32
    return %c0_i32, %c0_i32_0 : i32, i32
  }
  func.func @transform_2(%arg0: i32) -> (i32, i32) {
    %c0_i32 = arith.constant 0 : i32
    %c0_i32_0 = arith.constant 0 : i32
    return %arg0, %c0_i32 : i32, i32
  }
}

</mosaic_0001>

<bundles_post_ra>
// kernel: qwen3_moe_rmsnorm.1
= control target key start
LH: loop header
LB: loop body
LE: loop exit
PB: predicated region body
PF: predicated region fallthrough
CT: control target
= control target key end

     0   :  { %7 = vsyncpa [#allocation3], 0  ;;  %s184_s0 = inlined_call_operand.hbm [shape: f32[16,128], index: 0, kind: input, shape index: {}]   ;;  %s185_s1 = inlined_call_operand.vmem [shape: f32[1,128], index: 1, kind: input, shape index: {}]   ;;  %s186_s2 = inlined_call_operand.hbm [shape: f32[16,128], index: 2, kind: output, shape index: {}]  }
   0x1   :  { %8 = vsyncpa [#allocation4], 0  ;;  %s13_s11 = sshll.u32 %s184_s0, 4  ;;  %s150_s12 = smov [#allocation2]   ;;  %s14_s11 = int_to_ptr.hbm [resolvable:$true] %s13_s11 }
   0x2   :  { %s15_s13 = sshll.u32 %s150_s12, 4  ;;  %s151_s14 = smov 128   ;;  %s16_s13 = int_to_ptr.vmem [resolvable:$true] %s15_s13 }
   0x3   :  { %s152_s15 = smov 8  }
   0x4   :  { %21 = dma.hbm_to_vmem [thread:$0]  %s14_s11, 256, %s16_s13, [#allocation3], %s151_s14, %s151_s14, %s152_s15  }
   0x5   :  { %146 = dma.done.wait [#allocation3], 256  }
   0x6   :  { %147 = vsyncadd [#allocation3], 4294967040  ;;  %v28_v0 = vld [vmem:[#allocation2] sm:$0xff]  ;;  %v29_v2 = vld [vmem:[#allocation2 + $0x8] sm:$0xff]  ;;  %s153_s17 = smov [#allocation5]   ;;  %s76_s21 = sshll.u32 %s186_s2, 4  ;;  %s77_s21 = int_to_ptr.hbm [resolvable:$true] %s76_s21 }
   0x7   :  { %v30_v1 = vmul.f32 %v28_v0, %v28_v0  ;;  %v31_v3 = vmul.f32 %v29_v2, %v29_v2  ;;  %v93_v18 = vld [vmem:[%s185_s1] ss:$0 sm:$0xff]  ;;  %s74_s18 = sshll.u32 %s153_s17, 4  ;;  %s75_s18 = int_to_ptr.vmem [resolvable:$true] %s74_s18 }
   0x9   :  { %32 = vadd.xlane.f32.xlu0 %v30_v1 }
  0x11   :  { %34 = vadd.xlane.f32.xlu0 %v31_v3 }
  0x7c   :  { %v33_v4 = vpop.xlane.xlu0 %32 }
  0x7d   :  { %v36_v5 = vmul.f32 0.0078125, %v33_v4 }
  0x7f   :  { %v38_v6 = vadd.f32 1e-06, %v36_v5 }
  0x81   :  { %94 = vrsqrt.f32 %v38_v6  ;;  %vm46_vm1 = vweird.f32 %v38_v6 }
  0x84   :  { %v35_v7 = vpop.xlane.xlu0 %34 }
  0x85   :  { %v37_v8 = vmul.f32 0.0078125, %v35_v7 }
  0x87   :  { %v95_v9 = vpop.eup %94  ;;  %v39_v10 = vadd.f32 1e-06, %v37_v8 }
  0x88   :  { %v41_v11 = vmul.f32 %v95_v9, %v38_v6  ;;  %vm47_vm0 = vweird.f32 %v95_v9 }
  0x89   :  { %96 = vrsqrt.f32 %v39_v10  ;;  %vm48_vm2 = vmor %vm46_vm1, %vm47_vm0  ;;  %vm56_vm4 = vweird.f32 %v39_v10 }
  0x8a   :  { %v42_v12 = vmul.f32 %v95_v9, %v41_v11 }
  0x8c   :  { %v43_v13 = vmul.f32 0.5, %v42_v12 }
  0x8e   :  { %v44_v14 = vsub.f32 1.5, %v43_v13 }
  0x8f   :  { %v97_v15 = vpop.eup %96 }
  0x90   :  { %v45_v16 = vmul.f32 %v95_v9, %v44_v14  ;;  %v51_v17 = vmul.f32 %v97_v15, %v39_v10  ;;  %vm57_vm3 = vweird.f32 %v97_v15 }
  0x91   :  { %vm58_vm5 = vmor %vm56_vm4, %vm57_vm3 }
  0x92   :  { %v49_v19 = vsel %vm48_vm2, %v95_v9, %v45_v16  ;;  %v52_v20 = vmul.f32 %v97_v15, %v51_v17 }
  0x93   :  { %v61_v21 = vmul.f32 %v49_v19, %v28_v0 }
  0x94   :  { %v53_v22 = vmul.f32 0.5, %v52_v20 }
  0x95   :  { %v66_v23 = vmul.f32 %v93_v18, %v61_v21 }
  0x96   :  { %v54_v24 = vsub.f32 1.5, %v53_v22 }
  0x97   :  { %68 = vst [vmem:[#allocation5] sm:$0xff] %v66_v23 }
  0x98   :  { %v55_v25 = vmul.f32 %v97_v15, %v54_v24 }
  0x9a   :  { %v59_v26 = vsel %vm58_vm5, %v97_v15, %v55_v25 }
  0x9b   :  { %v62_v27 = vmul.f32 %v59_v26, %v29_v2 }
  0x9d   :  { %v67_v28 = vmul.f32 %v93_v18, %v62_v27 }
  0x9f   :  { %69 = vst [vmem:[#allocation5 + $0x8] sm:$0xff] %v67_v28 }
  0xa0   :  { %82 = dma.vmem_to_hbm [thread:$0]  %s75_s18, 256, %s77_s21, [#allocation4], %s151_s14, %s151_s14, %s152_s15  }
  0xa1   :  { %148 = dma.done.wait [#allocation4], 256  }
  0xa2   :  { %149 = vsyncadd [#allocation4], 4294967040 }
  0xa3   :  { %87 = vsyncpa [#allocation3], 1 }
  0xa4   :  { %88 = vsyncpa [#allocation4], 1 }

</bundles_post_ra>
